<compile_context>
chip_gen: v5e
topology: v5e:2x2
jax: 0.10.0
libtpu: 0.0.40
codegen_flags: <defaults>
</compile_context>

<pallas_src>
import math

import jax
import jax.numpy as jnp
from jax.experimental import pallas as pl
from jax.experimental.pallas import tpu as pltpu


def _make_gconv_kernel(use_col: bool, use_bias: bool, use_bf16: bool):
    """Build the kernel body for the given static configuration."""
    mxu_dtype = jnp.bfloat16 if use_bf16 else jnp.float32

    def kernel(*refs):
        idx = 0
        rl_ref = refs[idx]; idx += 1          # [TILE_N, N]     rowLap row tile
        x_ref = refs[idx]; idx += 1           # [N, in_f]       full
        w_ref = refs[idx]; idx += 1           # [in_f, out_f]   full
        cl_ref = None
        if use_col:
            cl_ref = refs[idx]; idx += 1      # [out_f, out_f]  full
        b_ref = None
        if use_bias:
            b_ref = refs[idx]; idx += 1       # [1, out_f]      f32
        o_ref = refs[idx]                     # [TILE_N, out_f]

        # tmp = rowLap_tile @ x   : [TILE_N, N] @ [N, in_f] -> [TILE_N, in_f]
        # (contraction over N done once, with only in_f output lanes).
        tmp = jnp.dot(rl_ref[...], x_ref[...], preferred_element_type=jnp.float32)

        # w_eff = weight (@ colLap) : tiny [in_f, out_f] matmul, fused per step.
        if use_col:
            w_eff = jnp.dot(w_ref[...], cl_ref[...],
                            preferred_element_type=jnp.float32).astype(mxu_dtype)
        else:
            w_eff = w_ref[...]

        # out = tmp @ w_eff : [TILE_N, in_f] @ [in_f, out_f] -> [TILE_N, out_f]
        out = jnp.dot(tmp.astype(mxu_dtype), w_eff,
                      preferred_element_type=jnp.float32)

        if use_bias:
            out = out + b_ref[...]            # bias add kept in f32
        o_ref[...] = out.astype(o_ref.dtype)

    return kernel


def _pick_row_tile(N: int, itemsize: int, desired: int = 256,
                   max_tile_bytes: int = 8 * 1024 * 1024) -> int:
    """Largest row tile that is a multiple of 8 (or == N), divides N, and keeps
    the [TILE_N, N] rowLap tile under max_tile_bytes."""
    if N <= desired and N * N * itemsize <= max_tile_bytes:
        return N
    budget_rows = max(8, max_tile_bytes // max(1, N * itemsize))
    t = min(desired, budget_rows)
    t = max(8, (t // 8) * 8)
    while t > 8 and N % t != 0:
        t -= 8
    if N % t != 0:
        return N  # no clean divisor: fall back to a single full block
    return t


def gconv_forward(x, weight, rowLap, colLap=None, bias=None, *,
                  use_bf16=False, row_tile=256):
    """Pallas implementation of GConv.forward(input, rowLap, colLap)."""
    N, in_f = x.shape
    out_f = weight.shape[1]
    use_col = colLap is not None
    use_bias = bias is not None

    # bf16 MXU operands (cast in the wrapper so the DMA'd bytes are halved too).
    if use_bf16:
        x = x.astype(jnp.bfloat16)
        weight = weight.astype(jnp.bfloat16)
        rowLap = rowLap.astype(jnp.bfloat16)
        if use_col:
            colLap = colLap.astype(jnp.bfloat16)
    itemsize = jnp.dtype(rowLap.dtype).itemsize

    tile_n = _pick_row_tile(N, itemsize, desired=row_tile)
    num_tiles = N // tile_n

    inputs = [rowLap, x, weight]
    in_specs = [
        pl.BlockSpec((tile_n, N), lambda i: (i, 0)),        # rowLap: row-tiled
        pl.BlockSpec((N, in_f), lambda i: (0, 0)),          # x: full (constant)
        pl.BlockSpec((in_f, out_f), lambda i: (0, 0)),      # weight: full
    ]
    if use_col:
        inputs.append(colLap)
        in_specs.append(pl.BlockSpec((out_f, out_f), lambda i: (0, 0)))
    if use_bias:
        inputs.append(bias.reshape(1, out_f).astype(jnp.float32))
        in_specs.append(pl.BlockSpec((1, out_f), lambda i: (0, 0)))

    out_spec = pl.BlockSpec((tile_n, out_f), lambda i: (i, 0))

    # Rough double-buffered VMEM need, with headroom; capped so it also fits
    # v7x's 64 MiB physical VMEM.
    needed = 2 * (
        tile_n * N * itemsize            # rowLap tile
        + N * in_f * itemsize            # x
        + in_f * out_f * itemsize        # weight
        + (out_f * out_f * itemsize if use_col else 0)
        + (out_f * 4 if use_bias else 0)
        + tile_n * out_f * 4             # output tile (f32)
    )
    vmem_limit = int(min(max(2 * needed, 16 * 2**20), 48 * 2**20))

    return pl.pallas_call(
        _make_gconv_kernel(use_col, use_bias, use_bf16),
        out_shape=jax.ShapeDtypeStruct((N, out_f), jnp.float32),
        grid=(num_tiles,),
        in_specs=in_specs,
        out_specs=out_spec,
        compiler_params=pltpu.CompilerParams(
            dimension_semantics=("parallel",),
            vmem_limit_bytes=vmem_limit,
        ),
    )(*inputs)


if __name__ == "__main__":
    # Small deterministic setup consistent with the module:
    #   N = 256 graph nodes, in_features = 16, out_features = 32
    # (N chosen so the row-tiled grid actually has >1 step: tile_n=128 below).
    N, in_features, out_features = 256, 16, 32

    key = jax.random.PRNGKey(0)
    k_x, k_rl, k_cl, k_w, k_b = jax.random.split(key, 5)

    # Module parameter init: uniform(-stdv, stdv), stdv = 1/sqrt(out_features)
    stdv = 1.0 / math.sqrt(out_features)
    weight = jax.random.uniform(
        k_w, (in_features, out_features), jnp.float32, minval=-stdv, maxval=stdv
    )
    bias = jax.random.uniform(
        k_b, (out_features,), jnp.float32, minval=-stdv, maxval=stdv
    )

    # Forward inputs
    x = jax.random.normal(k_x, (N, in_features), jnp.float32)
    rowLap = jax.random.normal(k_rl, (N, N), jnp.float32)
    colLap = jax.random.normal(k_cl, (out_features, out_features), jnp.float32)

    # f32 path, with colLap and bias (forward(input, rowLap, colLap))
    out = gconv_forward(x, weight, rowLap, colLap=colLap, bias=bias,
                        row_tile=128)
    out = jax.block_until_ready(out)

    # colLap=None path (forward(input, rowLap))
    out_no_col = gconv_forward(x, weight, rowLap, colLap=None, bias=bias,
                               row_tile=128)
    out_no_col = jax.block_until_ready(out_no_col)

    # bf16 MXU-operand path (accumulation stays f32)
    out_bf16 = gconv_forward(x, weight, rowLap, colLap=colLap, bias=bias,
                             use_bf16=True, row_tile=128)
    out_bf16 = jax.block_until_ready(out_bf16)

    # Reference in plain JAX (original operation order)
    ref = rowLap @ (x @ weight) @ colLap + bias
    ref_no_col = rowLap @ (x @ weight) + bias

    assert jnp.allclose(out, ref, rtol=1e-4, atol=1e-3)
    assert jnp.allclose(out_no_col, ref_no_col, rtol=1e-4, atol=1e-3)
    # bf16 operands -> relaxed tolerance
    assert jnp.allclose(out_bf16, ref, rtol=5e-2, atol=5e-1)

    print("KERNEL_OK")
</pallas_src>

<mosaic_0001>
module attributes {stable_mosaic.version = 11 : i64} {
  func.func @kernel(%arg0: i32, %arg1: memref<128x256xf32, #tpu.memory_space<vmem>>, %arg2: memref<256x16xf32, #tpu.memory_space<vmem>>, %arg3: memref<16x32xf32, #tpu.memory_space<vmem>>, %arg4: memref<32x32xf32, #tpu.memory_space<vmem>>, %arg5: memref<1x32xf32, #tpu.memory_space<vmem>>, %arg6: memref<128x32xf32, #tpu.memory_space<vmem>>) attributes {dimension_semantics = [#tpu.dimension_semantics<parallel>], iteration_bounds = array<i64: 2>, scalar_prefetch = 0 : i64, scratch_operands = 0 : i64, tpu.core_type = #tpu.core_type<tc>, window_params = [{transform_indices = @transform_0, window_bounds = array<i64: 128, 256>}, {pipeline_mode = #tpu.pipeline_mode<synchronous>, transform_indices = @transform_1, window_bounds = array<i64: 256, 16>}, {pipeline_mode = #tpu.pipeline_mode<synchronous>, transform_indices = @transform_2, window_bounds = array<i64: 16, 32>}, {pipeline_mode = #tpu.pipeline_mode<synchronous>, transform_indices = @transform_3, window_bounds = array<i64: 32, 32>}, {pipeline_mode = #tpu.pipeline_mode<synchronous>, transform_indices = @transform_4, window_bounds = array<i64: 1, 32>}, {transform_indices = @transform_5, window_bounds = array<i64: 128, 32>}]} {
    %c0 = arith.constant 0 : index
    %c0_0 = arith.constant 0 : index
    %0 = vector.load %arg1[%c0, %c0_0] : memref<128x256xf32, #tpu.memory_space<vmem>>, vector<128x256xf32>
    %c0_1 = arith.constant 0 : index
    %c0_2 = arith.constant 0 : index
    %1 = vector.load %arg2[%c0_1, %c0_2] : memref<256x16xf32, #tpu.memory_space<vmem>>, vector<256x16xf32>
    %cst = arith.constant dense<0.000000e+00> : vector<128x16xf32>
    %2 = tpu.matmul %0, %1, %cst {dimension_numbers = #tpu.dot_dimension_numbers<[1], [0], [0], [1], [0, 0, 1, 1], [], []>} : vector<128x256xf32>, vector<256x16xf32>, vector<128x16xf32> -> vector<128x16xf32>
    %c0_3 = arith.constant 0 : index
    %c0_4 = arith.constant 0 : index
    %3 = vector.load %arg3[%c0_3, %c0_4] : memref<16x32xf32, #tpu.memory_space<vmem>>, vector<16x32xf32>
    %c0_5 = arith.constant 0 : index
    %c0_6 = arith.constant 0 : index
    %4 = vector.load %arg4[%c0_5, %c0_6] : memref<32x32xf32, #tpu.memory_space<vmem>>, vector<32x32xf32>
    %cst_7 = arith.constant dense<0.000000e+00> : vector<16x32xf32>
    %5 = tpu.matmul %3, %4, %cst_7 {dimension_numbers = #tpu.dot_dimension_numbers<[1], [0], [0], [1], [0, 0, 1, 1], [], []>} : vector<16x32xf32>, vector<32x32xf32>, vector<16x32xf32> -> vector<16x32xf32>
    %cst_8 = arith.constant dense<0.000000e+00> : vector<128x32xf32>
    %6 = tpu.matmul %2, %5, %cst_8 {dimension_numbers = #tpu.dot_dimension_numbers<[1], [0], [0], [1], [0, 0, 1, 1], [], []>} : vector<128x16xf32>, vector<16x32xf32>, vector<128x32xf32> -> vector<128x32xf32>
    %c0_9 = arith.constant 0 : index
    %c0_10 = arith.constant 0 : index
    %7 = vector.load %arg5[%c0_9, %c0_10] : memref<1x32xf32, #tpu.memory_space<vmem>>, vector<1x32xf32>
    %8 = vector.broadcast %7 : vector<1x32xf32> to vector<128x32xf32>
    %9 = arith.addf %6, %8 : vector<128x32xf32>
    %c0_11 = arith.constant 0 : index
    %c0_12 = arith.constant 0 : index
    %10 = vector.load %arg6[%c0_11, %c0_12] : memref<128x32xf32, #tpu.memory_space<vmem>>, vector<128x32xf32>
    tpu.vector_store %arg6[%c0_11, %c0_12], %9 {strides = array<i32>} : memref<128x32xf32, #tpu.memory_space<vmem>>, vector<128x32xf32>,
    return
  }
  func.func @transform_0(%arg0: i32) -> (i32, i32) {
    %c0_i32 = arith.constant 0 : i32
    %c0_i32_0 = arith.constant 0 : i32
    return %arg0, %c0_i32 : i32, i32
  }
  func.func @transform_1(%arg0: i32) -> (i32, i32) {
    %c0_i32 = arith.constant 0 : i32
    %c0_i32_0 = arith.constant 0 : i32
    %c0_i32_1 = arith.constant 0 : i32
    return %c0_i32, %c0_i32_0 : i32, i32
  }
  func.func @transform_2(%arg0: i32) -> (i32, i32) {
    %c0_i32 = arith.constant 0 : i32
    %c0_i32_0 = arith.constant 0 : i32
    %c0_i32_1 = arith.constant 0 : i32
    return %c0_i32, %c0_i32_0 : i32, i32
  }
  func.func @transform_3(%arg0: i32) -> (i32, i32) {
    %c0_i32 = arith.constant 0 : i32
    %c0_i32_0 = arith.constant 0 : i32
    %c0_i32_1 = arith.constant 0 : i32
    return %c0_i32, %c0_i32_0 : i32, i32
  }
  func.func @transform_4(%arg0: i32) -> (i32, i32) {
    %c0_i32 = arith.constant 0 : i32
    %c0_i32_0 = arith.constant 0 : i32
    %c0_i32_1 = arith.constant 0 : i32
    return %c0_i32, %c0_i32_0 : i32, i32
  }
  func.func @transform_5(%arg0: i32) -> (i32, i32) {
    %c0_i32 = arith.constant 0 : i32
    %c0_i32_0 = arith.constant 0 : i32
    return %arg0, %c0_i32 : i32, i32
  }
}

</mosaic_0001>

<bundles_post_ra>
// kernel: tpu_custom_call.1
= control target key start
LH: loop header
LB: loop body
LE: loop exit
PB: predicated region body
PF: predicated region fallthrough
CT: control target
= control target key end

     0   :  { %10 = vsyncpa [#allocation3], 0  ;;  %s1193_s0 = inlined_call_operand.hbm [shape: f32[256,256], index: 0, kind: input, shape index: {}]   ;;  %s1194_s1 = inlined_call_operand.vmem [shape: f32[256,16], index: 1, kind: input, shape index: {}]   ;;  %s1195_s2 = inlined_call_operand.vmem [shape: f32[16,32], index: 2, kind: input, shape index: {}]   ;;  %s1196_s3 = inlined_call_operand.vmem [shape: f32[32,32], index: 3, kind: input, shape index: {}]   ;;  %s1197_s4 = inlined_call_operand.vmem [shape: f32[1,32], index: 4, kind: input, shape index: {}]   ;;  %s1198_s5 = inlined_call_operand.vmem [shape: f32[256,32], index: 5, kind: output, shape index: {}]  }
   0x1   :  { %12 = vsyncpa [#allocation3 + $0x1], 0  ;;  %s887_s18 = smov 0   ;;  %s889_s19 = smov 0  }
   0x2   :  { %s891_s20 = smov 0   ;;  %s893_s21 = smov 0  }
   0x3 LB: > { %s681_s22 = sadd.s32 4294967295, %s853_s21   ;;  %s907_s23 = sadd.s32 1, %s853_s21   ;;  %s853_s21 = sphi %s893_s21, %s1205_s21   ;;  %s849_s20 = sphi %s891_s20, %s1204_s20   ;;  %s845_s19 = sphi %s889_s19, %s1203_s19   ;;  %s841_s18 = sphi %s887_s18, %s1202_s18  }
   0x4   : > { %s22_s24 = ssub.s32 %s853_s21, %s907_s23  ;;  %s25_s25 = sadd.s32 1, %s849_s20 }
   0x5   : > { %p23_p0 = scmp.eq.s32.totalorder %s22_s24, 0  ;;  %p32_p1 = scmp.ne.s32.totalorder %s849_s20, %s845_s19 }
   0x6   : > { %p33_p2 = scmp.eq.s32.totalorder %s853_s21, 0  ;;  %p38_p3 = scmp.ne.s32.totalorder %s845_s19, %s841_s18 }
   0x7   : > { %s917_s26 = scalar_select %p23_p0, %s849_s20, %s25_s25  }
   0x8   : > { %p919_p4 = por %p33_p2, %p32_p1  ;;  %p39_p5 = scmp.eq.s32.totalorder %s681_s22, 0 }
   0x9   : > { %p753_p6 = scmp.lt.s32.totalorder %s853_s21, 2  ;;  %s184_s29 = sand.u32 1, %s849_s20  }
   0xa   : > { %p926_p7 = por %p39_p5, %p38_p3  ;;  %s685_s30 = sshll.u32 %s184_s29, 8 }
   0xb   : > { %s714_s6 = sshll.u32 %s853_s21, 8  ;;  %s188_s10 = scalar_lea.vmem [#allocation2], %s685_s30 }
   0xc   : > { %s194_s9 = scalar_lea.hbm %s1193_s0, %s714_s6  ;;  %s197_s11 = sshll.u32 %s188_s10, 4  ;;  %s198_s11 = int_to_ptr.vmem [resolvable:$true] %s197_s11 }
   0xd   : > { %s195_s12 = sshll.u32 %s194_s9, 4  ;;  %p937_p8 = pnand %p753_p6, %p919_p4  ;;  %s196_s12 = int_to_ptr.hbm [resolvable:$true] %s195_s12 }
   0xe   : > { %p689_p9 = scmp.ge.s32.totalorder %s853_s21, 1  ;;  %s185_s14 = scalar_lea.sflag [#allocation3], %s184_s29 }
   0xf   : > { %s789_s15 = sshra.s32 %s196_s12, 4  ;;  %p793_p11 = pneg %p937_p8  ;;  %s790_s15 = int_to_ptr.hbm [resolvable:$true] %s789_s15 }
  0x10   : > { %s791_s16 = scalar_lea.hbm %s790_s15, 256  ;;  %s796_s24 = scalar_lea.hbm %s1193_s0, 512 }
  0x11   : > { %p792_p10 = scmp.ne.s32.totalorder %s790_s15, %s791_s16  ;;  %p797_p0 = scmp.lt.s32.totalorder %s790_s15, %s1193_s0 }
  0x12   : > { %p798_p1 = scmp.lt.s32.totalorder %s796_s24, %s791_s16 }
  0x13   : > { %p794_p12 = pnand %p793_p11, %p792_p10 }
  0x14   : > { %p799_p2 = por %p798_p1, %p797_p0 }
  0x15   : > { %p795_p13 = pneg %p794_p12 }
  0x17   : > { %p800_p3 = pnand %p799_p2, %p795_p13 }
  0x19   : > { %803 = shalt.err (!%p800_p3)
}
  0x1a   : > { %s855_s29 = smov 256   ;;  %s856_s30 = smov 16  }
  0x1b   : > { %752 = dma.hbm_to_vmem [thread:$0]  (!%p937_p8), %s196_s12, 4096, %s198_s11, %s185_s14, %s855_s29, %s855_s29, %s856_s30  }
  0x1c   : > { %p205_p4 = scmp.lt.s32.totalorder %s853_s21, 3 }
  0x1e   : > { %p206_p5 = pnand %p689_p9, %p205_p4 }
  0x1f   : > { %s211_s6 = sand.u32 (!%p206_p5), 1, %s845_s19  }
  0x20   : > { %209 = sbr.rel (%p206_p5) target bundleno = 532 (0x214), region = 40  ;;  %s690_s7 = sshll.u32 (!%p206_p5), %s211_s6, 8 }
  0x21   : > { %s212_s8 = scalar_lea.sflag (!%p206_p5), [#allocation3], %s211_s6  ;;  %s956_s9 = scalar_lea.vmem (!%p206_p5), [#allocation2], %s690_s7 }
  0x25   : > { %836 = dma.done.wait (%p926_p7), %s212_s8, 4096  }
  0x26   : > { %838 = vsyncadd (%p926_p7), %s212_s8, 4294963200  ;;  %v297_v0 = vld [vmem:[%s1194_s1 + $0x78] sm:$0xff]  ;;  %v296_v1 = vld [vmem:[%s1194_s1 + $0x70] sm:$0xff]  ;;  %vm450_vm0 = vcmask 261120   ;;  %vm484_vm1 = vcmask 130048  }
  0x27   : > { %715 = vmatpush.msra.mxu2 %v297_v0  ;;  %314 = vmatpush.msra.mxu0 %v297_v0  ;;  %v295_v2 = vld [vmem:[%s1194_s1 + $0x68] sm:$0xff]  ;;  %v294_v3 = vld [vmem:[%s1194_s1 + $0x60] sm:$0xff]  ;;  %v977_v4 = vld [vmem:[%s1194_s1 + $0xf8] sm:$0xff] }
  0x28   : > { %v293_v5 = vld [vmem:[%s1194_s1 + $0x58] sm:$0xff]  ;;  %379 = vmatpush.msra.mxu1 %v977_v4  ;;  %v986_v6 = vld [vmem:[%s1194_s1 + $0xf0] sm:$0xff]  ;;  %v995_v8 = vld [vmem:[%s1194_s1 + $0xe8] sm:$0xff] }
  0x29   : > { %716 = vmatpush.msra.mxu2 %v296_v1  ;;  %315 = vmatpush.msra.mxu0 %v296_v1  ;;  %v292_v7 = vld [vmem:[%s1194_s1 + $0x50] sm:$0xff]  ;;  %v291_v9 = vld [vmem:[%s1194_s1 + $0x48] sm:$0xff]  ;;  %v310_v10 = vld [vmem:[%s1194_s1 + $0xe0] sm:$0xff] }
  0x2a   : > { %380 = vmatpush.msra.mxu1 %v986_v6  ;;  %v290_v11 = vld [vmem:[%s1194_s1 + $0x40] sm:$0xff]  ;;  %v309_v12 = vld [vmem:[%s1194_s1 + $0xd8] sm:$0xff]  ;;  %v308_v14 = vld [vmem:[%s1194_s1 + $0xd0] sm:$0xff] }
  0x2b   : > { %717 = vmatpush.msra.mxu2 %v295_v2  ;;  %316 = vmatpush.msra.mxu0 %v295_v2  ;;  %v289_v13 = vld [vmem:[%s1194_s1 + $0x38] sm:$0xff]  ;;  %v288_v15 = vld [vmem:[%s1194_s1 + $0x30] sm:$0xff]  ;;  %v307_v16 = vld [vmem:[%s1194_s1 + $0xc8] sm:$0xff] }
  0x2c   : > { %381 = vmatpush.msra.mxu1 %v995_v8  ;;  %v287_v17 = vld [vmem:[%s1194_s1 + $0x28] sm:$0xff]  ;;  %v306_v18 = vld [vmem:[%s1194_s1 + $0xc0] sm:$0xff]  ;;  %v305_v20 = vld [vmem:[%s1194_s1 + $0xb8] sm:$0xff] }
  0x2d   : > { %718 = vmatpush.msra.mxu2 %v294_v3  ;;  %317 = vmatpush.msra.mxu0 %v294_v3  ;;  %v286_v19 = vld [vmem:[%s1194_s1 + $0x20] sm:$0xff]  ;;  %v285_v21 = vld [vmem:[%s1194_s1 + $0x18] sm:$0xff]  ;;  %v304_v22 = vld [vmem:[%s1194_s1 + $0xb0] sm:$0xff] }
  0x2e   : > { %382 = vmatpush.msra.mxu1 %v310_v10  ;;  %v284_v23 = vld [vmem:[%s1194_s1 + $0x10] sm:$0xff]  ;;  %v303_v24 = vld [vmem:[%s1194_s1 + $0xa8] sm:$0xff]  ;;  %v302_v26 = vld [vmem:[%s1194_s1 + $0xa0] sm:$0xff] }
  0x2f   : > { %719 = vmatpush.msra.mxu2 %v293_v5  ;;  %318 = vmatpush.msra.mxu0 %v293_v5  ;;  %v283_v25 = vld [vmem:[%s1194_s1 + $0x8] sm:$0xff]  ;;  %v282_v27 = vld [vmem:[%s1194_s1] sm:$0xff]  ;;  %v301_v29 = vld [vmem:[%s1194_s1 + $0x98] sm:$0xff] }
  0x30   : > { %383 = vmatpush.msra.mxu1 %v309_v12  ;;  %v274_v28 = vld [vmem:[%s956_s9 + $0xc0] sm:$0xff]  ;;  %v300_v30 = vld [vmem:[%s1194_s1 + $0x90] sm:$0xff]  ;;  %v299_v31 = vld [vmem:[%s1194_s1 + $0x88] sm:$0xff] }
  0x31   : > { %720 = vmatpush.msra.mxu2 %v292_v7  ;;  %319 = vmatpush.msra.mxu0 %v292_v7  ;;  %v298_v32 = vld [vmem:[%s1194_s1 + $0x80] sm:$0xff]  ;;  %v276_v33 = vld [vmem:[%s956_s9 + $0xd0] sm:$0xff]  ;;  %v275_v36 = vld [vmem:[%s956_s9 + $0xc8] sm:$0xff] }
  0x32   : > { %384 = vmatpush.msra.mxu1 %v308_v14  ;;  %v278_v34 = vld [vmem:[%s956_s9 + $0xe0] sm:$0xff]  ;;  %v280_v35 = vld [vmem:[%s956_s9 + $0xf0] sm:$0xff]  ;;  %v449_v37 = vld [vmem:[%s1196_s3 + $0x18] sm:$0xff] }
  0x33   : > { %721 = vmatpush.msra.mxu2 %v291_v9  ;;  %320 = vmatpush.msra.mxu0 %v291_v9  ;;  %v448_v38 = vld [vmem:[%s1196_s3 + $0x10] sm:$0xff]  ;;  %v447_v39 = vld [vmem:[%s1196_s3 + $0x8] sm:$0xff]  ;;  %v446_v40 = vld [vmem:[%s1196_s3] sm:$0xff] }
  0x34   : > { %385 = vmatpush.msra.mxu1 %v307_v16  ;;  %v277_v41 = vld [vmem:[%s956_s9 + $0xd8] sm:$0xff]  ;;  %v250_v42 = vld [vmem:[%s956_s9] sm:$0xff]  ;;  %v251_v43 = vld [vmem:[%s956_s9 + $0x8] sm:$0xff] }
  0x35   : > { %722 = vmatpush.msra.mxu2 %v290_v11  ;;  %321 = vmatpush.msra.mxu0 %v290_v11  ;;  %v279_v44 = vld [vmem:[%s956_s9 + $0xe8] sm:$0xff]  ;;  %v252_v45 = vld [vmem:[%s956_s9 + $0x10] sm:$0xff]  ;;  %v253_v46 = vld [vmem:[%s956_s9 + $0x18] sm:$0xff] }
  0x36   : > { %386 = vmatpush.msra.mxu1 %v306_v18  ;;  %v281_v47 = vld [vmem:[%s956_s9 + $0xf8] sm:$0xff]  ;;  %v254_v48 = vld [vmem:[%s956_s9 + $0x20] sm:$0xff]  ;;  %v255_v49 = vld [vmem:[%s956_s9 + $0x28] sm:$0xff] }
  0x37   : > { %723 = vmatpush.msra.mxu2 %v289_v13  ;;  %322 = vmatpush.msra.mxu0 %v289_v13  ;;  %v444_v50 = vld [vmem:[%s1195_s2] sm:$0xff]  ;;  %v256_v51 = vld [vmem:[%s956_s9 + $0x30] sm:$0xff]  ;;  %v257_v52 = vld [vmem:[%s956_s9 + $0x38] sm:$0xff] }
  0x38   : > { %387 = vmatpush.msra.mxu1 %v305_v20  ;;  %v445_v53 = vld [vmem:[%s1195_s2 + $0x8] sm:$0xff]  ;;  %v258_v54 = vld [vmem:[%s956_s9 + $0x40] sm:$0xff]  ;;  %v260_v56 = vld [vmem:[%s956_s9 + $0x50] sm:$0xff] }
  0x39   : > { %724 = vmatpush.msra.mxu2 %v288_v15  ;;  %323 = vmatpush.msra.mxu0 %v288_v15  ;;  %v259_v55 = vld [vmem:[%s956_s9 + $0x48] sm:$0xff]  ;;  %v261_v57 = vld [vmem:[%s956_s9 + $0x58] sm:$0xff]  ;;  %v262_v58 = vld [vmem:[%s956_s9 + $0x60] sm:$0xff] }
  0x3a   : > { %388 = vmatpush.msra.mxu1 %v304_v22  ;;  %v263_v59 = vld [vmem:[%s956_s9 + $0x68] sm:$0xff]  ;;  %v264_v60 = vld [vmem:[%s956_s9 + $0x70] sm:$0xff]  ;;  %v265_v61 = vld [vmem:[%s956_s9 + $0x78] sm:$0xff] }
  0x3b   : > { %725 = vmatpush.msra.mxu2 %v287_v17  ;;  %324 = vmatpush.msra.mxu0 %v287_v17  ;;  %v266_v62 = vld [vmem:[%s956_s9 + $0x80] sm:$0xff]  ;;  %v267_v63 = vld [vmem:[%s956_s9 + $0x88] sm:$0xff]  ;;  %v268_v0 = vld [vmem:[%s956_s9 + $0x90] sm:$0xff] }
  0x3c   : > { %389 = vmatpush.msra.mxu1 %v303_v24  ;;  %v269_v1 = vld [vmem:[%s956_s9 + $0x98] sm:$0xff]  ;;  %v270_v2 = vld [vmem:[%s956_s9 + $0xa0] sm:$0xff]  ;;  %v271_v3 = vld [vmem:[%s956_s9 + $0xa8] sm:$0xff] }
  0x3d   : > { %726 = vmatpush.msra.mxu2 %v286_v19  ;;  %325 = vmatpush.msra.mxu0 %v286_v19  ;;  %v272_v5 = vld [vmem:[%s956_s9 + $0xb0] sm:$0xff] }
  0x3e   : > { %390 = vmatpush.msra.mxu1 %v302_v26 }
  0x3f   : > { %727 = vmatpush.msra.mxu2 %v285_v21  ;;  %326 = vmatpush.msra.mxu0 %v285_v21 }
  0x40   : > { %391 = vmatpush.msra.mxu1 %v301_v29 }
  0x41   : > { %728 = vmatpush.msra.mxu2 %v284_v23  ;;  %327 = vmatpush.msra.mxu0 %v284_v23 }
  0x42   : > { %392 = vmatpush.msra.mxu1 %v300_v30 }
  0x43   : > { %729 = vmatpush.msra.mxu2 %v283_v25  ;;  %328 = vmatpush.msra.mxu0 %v283_v25 }
  0x44   : > { %393 = vmatpush.msra.mxu1 %v299_v31 }
  0x45   : > { %730 = vmatpush.msra.mxu2 %v282_v27  ;;  %329 = vmatpush.msra.mxu0 %v282_v27 }
  0x46   : > { %366 = vmatmul.f32.vlgmr.msra.gmra.mxu2 %v274_v28  ;;  %394 = vmatpush.msra.mxu1 %v298_v32 }
  0x47   : > { %731 = vmatpush.msrb.mxu2 %v977_v4  ;;  %330 = vmatmul.f32.vlgmr.msra.gmra.mxu0 %v250_v42 }
  0x48   : > { %395 = vmatmul.f32.vlgmr.msra.gmra.mxu1 %v251_v43 }
  0x49   : > { %732 = vmatpush.msrb.mxu2 %v986_v6  ;;  %v273_v6 = vld [vmem:[%s956_s9 + $0xb8] sm:$0xff]  ;;  %s691_s9 = sshll.u32 %s681_s22, 4 }
  0x4a   : > { %p245_p6 = scmp.lt.s32.totalorder %s691_s9, 31 }
  0x4b   : > { %733 = vmatpush.msrb.mxu2 %v995_v8 }
  0x4c   : > { %s1207_s9 = smov (!%p245_p6, %s691_s9), 31 }
  0x4d   : > { %734 = vmatpush.msrb.mxu2 %v310_v10  ;;  %s692_s13 = sshll.u32 %s1207_s9, 3 }
  0x4e   : > { %369 = vmatmul.f32.gmra.mxu2 %v276_v33  ;;  %s1146_s18 = scalar_lea.vmem %s1198_s5, %s692_s13 }
  0x4f   : > { %735 = vmatpush.msrb.mxu2 %v309_v12  ;;  %333 = vmatmul.f32.gmra.mxu0 %v252_v45 }
  0x50   : > { %398 = vmatmul.f32.gmra.mxu1 %v253_v46 }
  0x51   : > { %736 = vmatpush.msrb.mxu2 %v308_v14 }
  0x53   : > { %737 = vmatpush.msrb.mxu2 %v307_v16 }
  0x55   : > { %738 = vmatpush.msrb.mxu2 %v306_v18 }
  0x56   : > { %372 = vmatmul.f32.gmra.mxu2 %v278_v34 }
  0x57   : > { %739 = vmatpush.msrb.mxu2 %v305_v20  ;;  %336 = vmatmul.f32.gmra.mxu0 %v254_v48 }
  0x58   : > { %401 = vmatmul.f32.gmra.mxu1 %v255_v49 }
  0x59   : > { %740 = vmatpush.msrb.mxu2 %v304_v22 }
  0x5b   : > { %741 = vmatpush.msrb.mxu2 %v303_v24 }
  0x5d   : > { %742 = vmatpush.msrb.mxu2 %v302_v26 }
  0x5e   : > { %375 = vmatmul.f32.gmra.mxu2 %v280_v35 }
  0x5f   : > { %743 = vmatpush.msrb.mxu2 %v301_v29  ;;  %339 = vmatmul.f32.gmra.mxu0 %v256_v51 }
  0x60   : > { %404 = vmatmul.f32.gmra.mxu1 %v257_v52 }
  0x61   : > { %744 = vmatpush.msrb.mxu2 %v300_v30 }
  0x63   : > { %745 = vmatpush.msrb.mxu2 %v299_v31 }
  0x65   : > { %746 = vmatpush.msrb.mxu2 %v298_v32 }
  0x66   : > { %431 = vmatmul.f32.vlgmr.msrb.gmra.mxu2 %v275_v36 }
  0x67   : > { %469 = vmatpush.msra.mxu2 %v449_v37  ;;  %342 = vmatmul.f32.gmra.mxu0 %v258_v54 }
  0x68   : > { %407 = vmatmul.f32.gmra.mxu1 %v259_v55 }
  0x69   : > { %470 = vmatpush.msra.mxu2 %v448_v38 }
  0x6b   : > { %471 = vmatpush.msra.mxu2 %v447_v39 }
  0x6d   : > { %472 = vmatpush.msra.mxu2 %v446_v40 }
  0x6e   : > { %434 = vmatmul.f32.gmra.mxu2 %v277_v41 }
  0x6f   : > { %345 = vmatmul.f32.gmra.mxu0 %v260_v56  ;;  %v788_v56 = vld [vmem:[%s1197_s4] ss:$0 sm:$0xff] }
  0x70   : > { %410 = vmatmul.f32.gmra.mxu1 %v261_v57 }
  0x76   : > { %437 = vmatmul.f32.gmra.mxu2 %v279_v44 }
  0x77   : > { %348 = vmatmul.f32.gmra.mxu0 %v262_v58 }
  0x78   : > { %413 = vmatmul.f32.gmra.mxu1 %v263_v59 }
  0x7e   : > { %440 = vmatmul.f32.gmra.mxu2 %v281_v47 }
  0x7f   : > { %351 = vmatmul.f32.gmra.mxu0 %v264_v60 }
  0x80   : > { %416 = vmatmul.f32.gmra.mxu1 %v265_v61 }
  0x86   : > { %693 = vmatmul.msk.f32.vlgmr.msra.gmra.mxu2 %vm450_vm0, %v444_v50 }
  0x87   : > { %354 = vmatmul.f32.gmra.mxu0 %v266_v62 }
  0x88   : > { %419 = vmatmul.f32.gmra.mxu1 %v267_v63 }
  0x8e   : > { %694 = vmatmul.msk.f32.gmra.mxu2 %vm450_vm0, %v445_v53 }
  0x8f   : > { %357 = vmatmul.f32.gmra.mxu0 %v268_v0 }
  0x90   : > { %422 = vmatmul.f32.gmra.mxu1 %v269_v1 }
  0x97   : > { %360 = vmatmul.f32.gmra.mxu0 %v270_v2 }
  0x98   : > { %425 = vmatmul.f32.gmra.mxu1 %v271_v3 }
  0x9f   : > { %363 = vmatmul.f32.gmra.mxu0 %v272_v5 }
  0xa0   : > { %428 = vmatmul.f32.gmra.mxu1 %v273_v6 }
  0xc4   : > { %v331_v14 = vpop.f32.mrf.mxu0 }
  0xc5   : > { %v396_v15 = vpop.f32.mrf.mxu1 }
  0xc6   : > { %v397_v26 = vadd.f32 %v396_v15, %v331_v14 }
  0xc9   : > { %v367_v4 = vpop.f32.mrf.mxu2 }
  0xcc   : > { %v334_v20 = vpop.f32.mrf.mxu0 }
  0xcd   : > { %v399_v21 = vpop.f32.mrf.mxu1 }
  0xce   : > { %v400_v29 = vadd.f32 %v399_v21, %v334_v20 }
  0xd1   : > { %v370_v7 = vpop.f32.mrf.mxu2 }
  0xd4   : > { %v337_v23 = vpop.f32.mrf.mxu0 }
  0xd5   : > { %v402_v24 = vpop.f32.mrf.mxu1 }
  0xd6   : > { %v403_v32 = vadd.f32 %v402_v24, %v337_v23 }
  0xd9   : > { %v373_v8 = vpop.f32.mrf.mxu2 }
  0xdc   : > { %v340_v27 = vpop.f32.mrf.mxu0 }
  0xdd   : > { %v405_v28 = vpop.f32.mrf.mxu1 }
  0xde   : > { %v406_v33 = vadd.f32 %v405_v28, %v340_v27 }
  0xe1   : > { %v376_v9 = vpop.f32.mrf.mxu2 }
  0xe4   : > { %v343_v30 = vpop.f32.mrf.mxu0 }
  0xe5   : > { %v408_v31 = vpop.f32.mrf.mxu1 }
  0xe6   : > { %v409_v36 = vadd.f32 %v408_v31, %v343_v30 }
  0xe9   : > { %v432_v10 = vpop.f32.mrf.mxu2 }
  0xea   : > { %v433_v11 = vadd.f32 %v432_v10, %v367_v4 }
  0xec   : > { %v346_v34 = vpop.f32.mrf.mxu0 }
  0xed   : > { %v411_v35 = vpop.f32.mrf.mxu1 }
  0xee   : > { %v412_v39 = vadd.f32 %v411_v35, %v346_v34 }
  0xf1   : > { %v435_v12 = vpop.f32.mrf.mxu2 }
  0xf2   : > { %v436_v13 = vadd.f32 %v435_v12, %v370_v7 }
  0xf4   : > { %v349_v37 = vpop.f32.mrf.mxu0 }
  0xf5   : > { %v414_v38 = vpop.f32.mrf.mxu1 }
  0xf6   : > { %v415_v42 = vadd.f32 %v414_v38, %v349_v37 }
  0xf9   : > { %v438_v16 = vpop.f32.mrf.mxu2 }
  0xfa   : > { %v439_v17 = vadd.f32 %v438_v16, %v373_v8 }
  0xfc   : > { %v352_v40 = vpop.f32.mrf.mxu0 }
  0xfd   : > { %v417_v41 = vpop.f32.mrf.mxu1 }
  0xfe   : > { %v418_v45 = vadd.f32 %v417_v41, %v352_v40 }
 0x101   : > { %v441_v18 = vpop.f32.mrf.mxu2 }
 0x102   : > { %v442_v19 = vadd.f32 %v441_v18, %v376_v9 }
 0x104   : > { %v355_v43 = vpop.f32.mrf.mxu0 }
 0x105   : > { %v420_v44 = vpop.f32.mrf.mxu1 }
 0x106   : > { %v421_v46 = vadd.f32 %v420_v44, %v355_v43 }
 0x109   : > { %v474_v22 = vpop.f32.mrf.mxu2 }
 0x10c   : > { %v358_v47 = vpop.f32.mrf.mxu0 }
 0x10d   : > { %v423_v48 = vpop.f32.mrf.mxu1 }
 0x10e   : > { %v424_v49 = vadd.f32 %v423_v48, %v358_v47 }
 0x111   : > { %v477_v25 = vpop.f32.mrf.mxu2 }
 0x112   : > { %547 = vmatpush.msra.mxu3 %v477_v25 }
 0x114   : > { %548 = vmatpush.msra.mxu3 %v474_v22  ;;  %v361_v50 = vpop.f32.mrf.mxu0 }
 0x115   : > { %695 = vmatmul.msk.f32.vlgmr.msra.gmra.mxu3 %vm484_vm1, %v397_v26  ;;  %v426_v51 = vpop.f32.mrf.mxu1 }
 0x116   : > { %v427_v52 = vadd.f32 %v426_v51, %v361_v50 }
 0x11c   : > { %v364_v53 = vpop.f32.mrf.mxu0 }
 0x11d   : > { %696 = vmatmul.msk.f32.gmra.mxu3 %vm484_vm1, %v400_v29  ;;  %v429_v54 = vpop.f32.mrf.mxu1 }
 0x11e   : > { %v430_v55 = vadd.f32 %v429_v54, %v364_v53 }
 0x125   : > { %697 = vmatmul.msk.f32.gmra.mxu3 %vm484_vm1, %v403_v32 }
 0x12d   : > { %698 = vmatmul.msk.f32.gmra.mxu3 %vm484_vm1, %v406_v33 }
 0x135   : > { %699 = vmatmul.msk.f32.gmra.mxu3 %vm484_vm1, %v409_v36 }
 0x13d   : > { %700 = vmatmul.msk.f32.gmra.mxu3 %vm484_vm1, %v412_v39 }
 0x145   : > { %701 = vmatmul.msk.f32.gmra.mxu3 %vm484_vm1, %v415_v42 }
 0x14d   : > { %702 = vmatmul.msk.f32.gmra.mxu3 %vm484_vm1, %v418_v45 }
 0x155   : > { %703 = vmatmul.msk.f32.gmra.mxu3 %vm484_vm1, %v421_v46 }
 0x15d   : > { %704 = vmatmul.msk.f32.gmra.mxu3 %vm484_vm1, %v424_v49 }
 0x165   : > { %705 = vmatmul.msk.f32.gmra.mxu3 %vm484_vm1, %v427_v52 }
 0x16d   : > { %706 = vmatmul.msk.f32.gmra.mxu3 %vm484_vm1, %v430_v55 }
 0x175   : > { %707 = vmatmul.msk.f32.gmra.mxu3 %vm484_vm1, %v433_v11 }
 0x17d   : > { %708 = vmatmul.msk.f32.gmra.mxu3 %vm484_vm1, %v436_v13 }
 0x185   : > { %709 = vmatmul.msk.f32.gmra.mxu3 %vm484_vm1, %v439_v17 }
 0x18d   : > { %710 = vmatmul.msk.f32.gmra.mxu3 %vm484_vm1, %v442_v19 }
 0x198   : > { %v550_v57 = vpop.f32.mrf.mxu3 }
 0x199   : > { %v551_v58 = vadd.f32 %v788_v56, %v550_v57 }
 0x19b   : > { %598 = vst.msk [vmem:[%s1146_s18] sm:$0xff] %vm450_vm0, %v551_v58 }
 0x1a0   : > { %v553_v59 = vpop.f32.mrf.mxu3 }
 0x1a1   : > { %v554_v60 = vadd.f32 %v788_v56, %v553_v59 }
 0x1a3   : > { %599 = vst.msk [vmem:[%s1146_s18 + $0x8] sm:$0xff] %vm450_vm0, %v554_v60 }
 0x1a8   : > { %v556_v61 = vpop.f32.mrf.mxu3 }
 0x1a9   : > { %v557_v62 = vadd.f32 %v788_v56, %v556_v61 }
 0x1ab   : > { %600 = vst.msk [vmem:[%s1146_s18 + $0x10] sm:$0xff] %vm450_vm0, %v557_v62 }
 0x1b0   : > { %v559_v63 = vpop.f32.mrf.mxu3 }
 0x1b1   : > { %v560_v0 = vadd.f32 %v788_v56, %v559_v63 }
 0x1b3   : > { %601 = vst.msk [vmem:[%s1146_s18 + $0x18] sm:$0xff] %vm450_vm0, %v560_v0 }
 0x1b8   : > { %v562_v1 = vpop.f32.mrf.mxu3 }
 0x1b9   : > { %v563_v2 = vadd.f32 %v788_v56, %v562_v1 }
 0x1bb   : > { %602 = vst.msk [vmem:[%s1146_s18 + $0x20] sm:$0xff] %vm450_vm0, %v563_v2 }
 0x1c0   : > { %v565_v3 = vpop.f32.mrf.mxu3 }
 0x1c1   : > { %v566_v4 = vadd.f32 %v788_v56, %v565_v3 }
 0x1c3   : > { %603 = vst.msk [vmem:[%s1146_s18 + $0x28] sm:$0xff] %vm450_vm0, %v566_v4 }
 0x1c8   : > { %v568_v5 = vpop.f32.mrf.mxu3 }
 0x1c9   : > { %v569_v6 = vadd.f32 %v788_v56, %v568_v5 }
 0x1cb   : > { %604 = vst.msk [vmem:[%s1146_s18 + $0x30] sm:$0xff] %vm450_vm0, %v569_v6 }
 0x1d0   : > { %v571_v7 = vpop.f32.mrf.mxu3 }
 0x1d1   : > { %v572_v8 = vadd.f32 %v788_v56, %v571_v7 }
 0x1d3   : > { %605 = vst.msk [vmem:[%s1146_s18 + $0x38] sm:$0xff] %vm450_vm0, %v572_v8 }
 0x1d8   : > { %v574_v9 = vpop.f32.mrf.mxu3 }
 0x1d9   : > { %v575_v10 = vadd.f32 %v788_v56, %v574_v9 }
 0x1db   : > { %606 = vst.msk [vmem:[%s1146_s18 + $0x40] sm:$0xff] %vm450_vm0, %v575_v10 }
 0x1e0   : > { %v577_v11 = vpop.f32.mrf.mxu3 }
 0x1e1   : > { %v578_v12 = vadd.f32 %v788_v56, %v577_v11 }
 0x1e3   : > { %607 = vst.msk [vmem:[%s1146_s18 + $0x48] sm:$0xff] %vm450_vm0, %v578_v12 }
 0x1e8   : > { %v580_v13 = vpop.f32.mrf.mxu3 }
 0x1e9   : > { %v581_v14 = vadd.f32 %v788_v56, %v580_v13 }
 0x1eb   : > { %608 = vst.msk [vmem:[%s1146_s18 + $0x50] sm:$0xff] %vm450_vm0, %v581_v14 }
 0x1f0   : > { %v583_v15 = vpop.f32.mrf.mxu3 }
 0x1f1   : > { %v584_v16 = vadd.f32 %v788_v56, %v583_v15 }
 0x1f3   : > { %609 = vst.msk [vmem:[%s1146_s18 + $0x58] sm:$0xff] %vm450_vm0, %v584_v16 }
 0x1f8   : > { %v586_v17 = vpop.f32.mrf.mxu3 }
 0x1f9   : > { %v587_v18 = vadd.f32 %v788_v56, %v586_v17 }
 0x1fb   : > { %610 = vst.msk [vmem:[%s1146_s18 + $0x60] sm:$0xff] %vm450_vm0, %v587_v18 }
 0x200   : > { %v589_v19 = vpop.f32.mrf.mxu3 }
 0x201   : > { %v590_v20 = vadd.f32 %v788_v56, %v589_v19 }
 0x203   : > { %611 = vst.msk [vmem:[%s1146_s18 + $0x68] sm:$0xff] %vm450_vm0, %v590_v20 }
 0x208   : > { %v592_v21 = vpop.f32.mrf.mxu3 }
 0x209   : > { %v593_v22 = vadd.f32 %v788_v56, %v592_v21 }
 0x20b   : > { %612 = vst.msk [vmem:[%s1146_s18 + $0x70] sm:$0xff] %vm450_vm0, %v593_v22 }
 0x210   : > { %v595_v23 = vpop.f32.mrf.mxu3 }
 0x211   : > { %v596_v24 = vadd.f32 %v788_v56, %v595_v23 }
 0x213   : > { %613 = vst.msk [vmem:[%s1146_s18 + $0x78] sm:$0xff] %vm450_vm0, %v596_v24 }
 0x214 PF: > { %p15_p7 = scmp.ge.s32.totalorder %s907_s23, 4   ;;  %s1202_s18 = smov %s845_s19 }
 0x215   : > { %s1203_s19 = smov %s849_s20  ;;  %s1204_s20 = smov %s917_s26 }
 0x216   : > { %s1205_s21 = smov %s907_s23  ;;  %17 = sbr.rel (!%p15_p7) target bundleno = 3 (0x3), region = 80 }
 0x21b   :  { %636 = vsyncpa [#allocation3], 1 }
 0x21c   :  { %638 = vsyncpa [#allocation3 + $0x1], 1 }

</bundles_post_ra>
